<compile_context>
chip_gen: v6e
topology: v6e:2x2x1
jax: 0.10.0
libtpu: 0.0.40
codegen_flags: <defaults>
</compile_context>

<pallas_src>
import functools

import jax
import jax.numpy as jnp
from jax.experimental import pallas as pl
from jax.experimental.pallas import tpu as pltpu

IN_DIM = 5
HIDDEN = 50
OUT_DIM = 5
N_HIDDEN_LAYERS = 6          # 6 hidden ReLU layers + 1 linear output layer
N_MID = N_HIDDEN_LAYERS - 1  # hidden->hidden (50x50) layers

IN_PAD = 8    # 5 features + 1 constant-one row (bias fold) + 2 zero rows
HID_PAD = 64  # 50 hidden units + 1 constant-one row, padded to sublane-aligned 64
OUT_PAD = 8   # 5 outputs padded to 8 -> unmasked vector stores
ONE_ROW = HIDDEN  # index of the constant-one row in hidden space


# ---------------------------------------------------------------------------
# Feature extraction (tiny elementwise glue on [B,4] vectors), emitted directly
# in the transposed lane-dense [IN_PAD, B] layout the kernel consumes.
# TODO(synk): jnp.arctan2 has no reliable Mosaic lowering, so get_acas_state
#             stays in plain JAX; XLA fuses it into one op before the Pallas call.
# ---------------------------------------------------------------------------
def wtp(x):
    return jnp.remainder(x + jnp.pi, 2.0 * jnp.pi) - jnp.pi


def get_acas_state_t(own_state, int_state):
    """[B,4],[B,4] -> [IN_PAD, B]; row IN_DIM is the constant-1 bias-fold row."""
    dx = own_state[:, 0] - int_state[:, 0]
    dy = own_state[:, 1] - int_state[:, 1]
    dist = jnp.sqrt(dx * dx + dy * dy)
    theta = wtp(2.0 * jnp.pi - own_state[:, 2]
                + jnp.arctan2(int_state[:, 1], int_state[:, 0]))
    psi = wtp(int_state[:, 2] - own_state[:, 2])
    ones = jnp.ones_like(dist)
    zeros = jnp.zeros_like(dist)
    return jnp.stack(
        [dist, theta, psi, own_state[:, 3], int_state[:, 3], ones, zeros, zeros],
        axis=0).astype(jnp.float32)


# ---------------------------------------------------------------------------
# Pallas kernel: full ACAS Xu MLP (7 matmuls + 6 ReLUs), transposed layout,
# biases folded into each matmul via the constant-one row.
#   state_ref : [IN_PAD,  TILE_B] f32   (batch on lanes, row 5 == 1.0)
#   w0_ref    : [HID_PAD, IN_PAD]  bf16 (col 5 = bias; row 50 propagates the 1)
#   wmid_ref  : [N_MID, HID_PAD, HID_PAD] bf16
#   wout_ref  : [OUT_PAD, HID_PAD] bf16 (col 50 = output bias)
#   out_ref   : [OUT_PAD, TILE_B] f32
# ---------------------------------------------------------------------------
def acas_mlp_kernel(state_ref, w0_ref, wmid_ref, wout_ref, out_ref, *, act_dtype):
    h = state_ref[...].astype(jnp.bfloat16)

    # Layer 0: (5+1) -> 50, ReLU (bias folded into the matmul).
    h = jnp.maximum(
        jnp.dot(w0_ref[...], h, preferred_element_type=act_dtype), 0.0)

    # Hidden layers 1..5: 50 -> 50, ReLU. The constant-one row self-propagates.
    for i in range(N_MID):
        h = jnp.maximum(
            jnp.dot(wmid_ref[i], h.astype(jnp.bfloat16),
                    preferred_element_type=act_dtype), 0.0)

    # Output layer: 50 -> 5 (padded to 8), linear, f32 accumulation.
    out_ref[...] = jnp.dot(wout_ref[...], h.astype(jnp.bfloat16),
                           preferred_element_type=jnp.float32)


# ---------------------------------------------------------------------------
# Tiling heuristics (generation-aware, host-side).
# ---------------------------------------------------------------------------
def _device_kind():
    try:
        return jax.devices()[0].device_kind.lower()
    except Exception:
        return ""


def _choose_tile_b(B, kind):
    b128 = pl.cdiv(max(B, 1), 128) * 128
    if b128 <= 128:
        return 128
    # Per-tile work is tiny (~13 MFLOP) so amortize the ~0.35us/step grid
    # overhead with big lane-dense tiles; cap lower on v5e (1 vst slot, f32 path).
    cap = 1024 if "v5" in kind else 2048
    steps = max(1, pl.cdiv(b128, cap))
    if ("7" in kind) or ("v4" in kind) or ("v3" in kind):
        # 2 TensorCores/chip: need >=2 (even) grid steps for megacore sharding.
        steps = max(2, steps)
        steps += steps % 2
    tile = pl.cdiv(pl.cdiv(b128, steps), 128) * 128
    return min(tile, b128)


def acas_mlp(state_t, packed, *, tile_b=None):
    """state_t: [IN_PAD, B] f32; packed: (w0p, wmidp, woutp) bf16.  Returns [B, 5]."""
    w0p, wmidp, woutp = packed
    B = state_t.shape[1]
    kind = _device_kind()
    if tile_b is None:
        tile_b = _choose_tile_b(B, kind)
    b_pad = pl.cdiv(B, tile_b) * tile_b
    if b_pad != B:
        state_t = jnp.pad(state_t, ((0, 0), (0, b_pad - B)))

    # bf16 inter-layer activations where the VALU supports bf16 (v6e / v7x);
    # keep f32 activations on older chips (v5e has no bf16 VPU).
    act_dtype = jnp.bfloat16 if (("v6" in kind) or ("7" in kind)) else jnp.float32
    kernel = functools.partial(acas_mlp_kernel, act_dtype=act_dtype)

    flops = 2 * b_pad * (HID_PAD * IN_PAD + N_MID * HID_PAD * HID_PAD
                         + OUT_PAD * HID_PAD)
    param_bytes = (w0p.size + wmidp.size + woutp.size) * 2
    bytes_accessed = b_pad * (IN_PAD + OUT_PAD) * 4 + param_bytes

    out_t = pl.pallas_call(
        kernel,
        out_shape=jax.ShapeDtypeStruct((OUT_PAD, b_pad), jnp.float32),
        grid=(b_pad // tile_b,),
        in_specs=[
            pl.BlockSpec((IN_PAD, tile_b), lambda i: (0, i)),
            # Parameters: full-array blocks, constant index_map -> VMEM-resident.
            pl.BlockSpec(w0p.shape, lambda i: (0, 0)),
            pl.BlockSpec(wmidp.shape, lambda i: (0, 0, 0)),
            pl.BlockSpec(woutp.shape, lambda i: (0, 0)),
        ],
        out_specs=pl.BlockSpec((OUT_PAD, tile_b), lambda i: (0, i)),
        compiler_params=pltpu.CompilerParams(
            dimension_semantics=("parallel",)),
        cost_estimate=pl.CostEstimate(
            flops=flops, transcendentals=0, bytes_accessed=bytes_accessed),
    )(state_t, w0p, wmidp, woutp)

    return out_t[:OUT_DIM, :B].T


# ---------------------------------------------------------------------------
# Model wrapper (PyTorch Model.forward equivalent).
# ---------------------------------------------------------------------------
def make_params(key):
    """Deterministic synthetic ACAS Xu MLP parameters: (W [in,out], b [out])."""
    dims = [IN_DIM] + [HIDDEN] * N_HIDDEN_LAYERS + [OUT_DIM]
    params = []
    for i in range(len(dims) - 1):
        key, kw, kb = jax.random.split(key, 3)
        fan_in = dims[i]
        w = jax.random.normal(kw, (dims[i], dims[i + 1]), jnp.float32) / jnp.sqrt(
            jnp.float32(fan_in))
        b = 0.01 * jax.random.normal(kb, (dims[i + 1],), jnp.float32)
        params.append((w, b))
    return params


def pack_params(params):
    """Repack (W [in,out], b) pairs into padded, bias-folded kernel layout.

    Each padded weight W' satisfies  W' @ [h; 1; 0...] = [W h + b; 1; 0...],
    so the kernel needs no bias adds and the constant-one row self-propagates.
    """
    w0, b0 = params[0]
    w0p = jnp.zeros((HID_PAD, IN_PAD), jnp.float32)
    w0p = w0p.at[:HIDDEN, :IN_DIM].set(w0.T)
    w0p = w0p.at[:HIDDEN, IN_DIM].set(b0)
    w0p = w0p.at[ONE_ROW, IN_DIM].set(1.0)

    mids = []
    for i in range(1, 1 + N_MID):
        w, b = params[i]
        wp = jnp.zeros((HID_PAD, HID_PAD), jnp.float32)
        wp = wp.at[:HIDDEN, :HIDDEN].set(w.T)
        wp = wp.at[:HIDDEN, ONE_ROW].set(b)
        wp = wp.at[ONE_ROW, ONE_ROW].set(1.0)
        mids.append(wp)
    wmidp = jnp.stack(mids)

    wout, bout = params[-1]
    woutp = jnp.zeros((OUT_PAD, HID_PAD), jnp.float32)
    woutp = woutp.at[:OUT_DIM, :HIDDEN].set(wout.T)
    woutp = woutp.at[:OUT_DIM, ONE_ROW].set(bout)

    return (w0p.astype(jnp.bfloat16),
            wmidp.astype(jnp.bfloat16),
            woutp.astype(jnp.bfloat16))


def model_forward(x, y, packed):
    state_t = get_acas_state_t(x, y)       # [IN_PAD, B]
    return acas_mlp(state_t, packed)       # [B, 5]


def mlp_ref(state, params):
    """Pure-JAX f32 reference: state [B,5] -> [B,5]."""
    h = state
    for i, (w, b) in enumerate(params):
        h = h @ w + b
        if i + 1 < len(params):
            h = jnp.maximum(h, 0.0)
    return h


if __name__ == "__main__":
    key = jax.random.PRNGKey(0)
    k_params, k_x, k_y = jax.random.split(key, 3)

    params = make_params(k_params)
    packed = pack_params(params)

    B = 8
    # own_state / int_state: [B, 4] = (x_pos, y_pos, heading, speed)
    scale = jnp.array([1000.0, 1000.0, 1.0, 100.0], jnp.float32)
    x = jax.random.normal(k_x, (B, 4), jnp.float32) * scale
    y = jax.random.normal(k_y, (B, 4), jnp.float32) * scale

    fwd = jax.jit(lambda a, b: model_forward(a, b, packed))
    out = fwd(x, y)
    jax.block_until_ready(out)

    assert out.shape == (B, OUT_DIM), out.shape
    assert out.dtype == jnp.float32
    assert bool(jnp.all(jnp.isfinite(out)))

    # Loose f32 reference check (kernel runs bf16 weights/activations).
    ref = mlp_ref(get_acas_state_t(x, y)[:IN_DIM].T, params)
    err = float(jnp.max(jnp.abs(out - ref)))
    ref_scale = float(jnp.max(jnp.abs(ref))) + 1e-6
    assert err <= 0.08 * ref_scale + 1e-3, (err, ref_scale)

    print("KERNEL_OK")
</pallas_src>

<mosaic_0001>
module attributes {stable_mosaic.version = 11 : i64} {
  func.func @acas_mlp_kernel(%arg0: i32, %arg1: memref<8x128xf32, #tpu.memory_space<vmem>>, %arg2: memref<64x8xbf16, #tpu.memory_space<vmem>>, %arg3: memref<5x64x64xbf16, #tpu.memory_space<vmem>>, %arg4: memref<8x64xbf16, #tpu.memory_space<vmem>>, %arg5: memref<8x128xf32, #tpu.memory_space<vmem>>) attributes {dimension_semantics = [#tpu.dimension_semantics<parallel>], iteration_bounds = array<i64: 1>, scalar_prefetch = 0 : i64, scratch_operands = 0 : i64, tpu.core_type = #tpu.core_type<tc>, window_params = [{transform_indices = @transform_0, window_bounds = array<i64: 8, 128>}, {pipeline_mode = #tpu.pipeline_mode<synchronous>, transform_indices = @transform_1, window_bounds = array<i64: 64, 8>}, {pipeline_mode = #tpu.pipeline_mode<synchronous>, transform_indices = @transform_2, window_bounds = array<i64: 5, 64, 64>}, {pipeline_mode = #tpu.pipeline_mode<synchronous>, transform_indices = @transform_3, window_bounds = array<i64: 8, 64>}, {transform_indices = @transform_4, window_bounds = array<i64: 8, 128>}]} {
    %c0 = arith.constant 0 : index
    %c0_0 = arith.constant 0 : index
    %0 = vector.load %arg1[%c0, %c0_0] : memref<8x128xf32, #tpu.memory_space<vmem>>, vector<8x128xf32>
    %1 = arith.truncf %0 : vector<8x128xf32> to vector<8x128xbf16>
    %c0_1 = arith.constant 0 : index
    %c0_2 = arith.constant 0 : index
    %2 = vector.load %arg2[%c0_1, %c0_2] : memref<64x8xbf16, #tpu.memory_space<vmem>>, vector<64x8xbf16>
    %cst = arith.constant dense<0.000000e+00> : vector<64x128xf32>
    %3 = tpu.matmul %2, %1, %cst {dimension_numbers = #tpu.dot_dimension_numbers<[1], [0], [0], [1], [0, 0, 1, 1], [], []>} : vector<64x8xbf16>, vector<8x128xbf16>, vector<64x128xf32> -> vector<64x128xf32>
    %cst_3 = arith.constant 0.000000e+00 : f32
    %4 = vector.broadcast %cst_3 : f32 to vector<64x128xf32>
    %5 = arith.maximumf %3, %4 : vector<64x128xf32>
    %c0_4 = arith.constant 0 : index
    %c0_5 = arith.constant 0 : index
    %c0_6 = arith.constant 0 : index
    %6 = vector.load %arg3[%c0_4, %c0_5, %c0_6] : memref<5x64x64xbf16, #tpu.memory_space<vmem>>, vector<1x64x64xbf16>
    %7 = vector.shape_cast %6 : vector<1x64x64xbf16> to vector<64x64xbf16>
    %8 = arith.truncf %5 : vector<64x128xf32> to vector<64x128xbf16>
    %cst_7 = arith.constant dense<0.000000e+00> : vector<64x128xf32>
    %9 = tpu.matmul %7, %8, %cst_7 {dimension_numbers = #tpu.dot_dimension_numbers<[1], [0], [0], [1], [0, 0, 1, 1], [], []>} : vector<64x64xbf16>, vector<64x128xbf16>, vector<64x128xf32> -> vector<64x128xf32>
    %cst_8 = arith.constant 0.000000e+00 : f32
    %10 = vector.broadcast %cst_8 : f32 to vector<64x128xf32>
    %11 = arith.maximumf %9, %10 : vector<64x128xf32>
    %c1 = arith.constant 1 : index
    %c0_9 = arith.constant 0 : index
    %c0_10 = arith.constant 0 : index
    %12 = vector.load %arg3[%c1, %c0_9, %c0_10] : memref<5x64x64xbf16, #tpu.memory_space<vmem>>, vector<1x64x64xbf16>
    %13 = vector.shape_cast %12 : vector<1x64x64xbf16> to vector<64x64xbf16>
    %14 = arith.truncf %11 : vector<64x128xf32> to vector<64x128xbf16>
    %cst_11 = arith.constant dense<0.000000e+00> : vector<64x128xf32>
    %15 = tpu.matmul %13, %14, %cst_11 {dimension_numbers = #tpu.dot_dimension_numbers<[1], [0], [0], [1], [0, 0, 1, 1], [], []>} : vector<64x64xbf16>, vector<64x128xbf16>, vector<64x128xf32> -> vector<64x128xf32>
    %cst_12 = arith.constant 0.000000e+00 : f32
    %16 = vector.broadcast %cst_12 : f32 to vector<64x128xf32>
    %17 = arith.maximumf %15, %16 : vector<64x128xf32>
    %c2 = arith.constant 2 : index
    %c0_13 = arith.constant 0 : index
    %c0_14 = arith.constant 0 : index
    %18 = vector.load %arg3[%c2, %c0_13, %c0_14] : memref<5x64x64xbf16, #tpu.memory_space<vmem>>, vector<1x64x64xbf16>
    %19 = vector.shape_cast %18 : vector<1x64x64xbf16> to vector<64x64xbf16>
    %20 = arith.truncf %17 : vector<64x128xf32> to vector<64x128xbf16>
    %cst_15 = arith.constant dense<0.000000e+00> : vector<64x128xf32>
    %21 = tpu.matmul %19, %20, %cst_15 {dimension_numbers = #tpu.dot_dimension_numbers<[1], [0], [0], [1], [0, 0, 1, 1], [], []>} : vector<64x64xbf16>, vector<64x128xbf16>, vector<64x128xf32> -> vector<64x128xf32>
    %cst_16 = arith.constant 0.000000e+00 : f32
    %22 = vector.broadcast %cst_16 : f32 to vector<64x128xf32>
    %23 = arith.maximumf %21, %22 : vector<64x128xf32>
    %c3 = arith.constant 3 : index
    %c0_17 = arith.constant 0 : index
    %c0_18 = arith.constant 0 : index
    %24 = vector.load %arg3[%c3, %c0_17, %c0_18] : memref<5x64x64xbf16, #tpu.memory_space<vmem>>, vector<1x64x64xbf16>
    %25 = vector.shape_cast %24 : vector<1x64x64xbf16> to vector<64x64xbf16>
    %26 = arith.truncf %23 : vector<64x128xf32> to vector<64x128xbf16>
    %cst_19 = arith.constant dense<0.000000e+00> : vector<64x128xf32>
    %27 = tpu.matmul %25, %26, %cst_19 {dimension_numbers = #tpu.dot_dimension_numbers<[1], [0], [0], [1], [0, 0, 1, 1], [], []>} : vector<64x64xbf16>, vector<64x128xbf16>, vector<64x128xf32> -> vector<64x128xf32>
    %cst_20 = arith.constant 0.000000e+00 : f32
    %28 = vector.broadcast %cst_20 : f32 to vector<64x128xf32>
    %29 = arith.maximumf %27, %28 : vector<64x128xf32>
    %c4 = arith.constant 4 : index
    %c0_21 = arith.constant 0 : index
    %c0_22 = arith.constant 0 : index
    %30 = vector.load %arg3[%c4, %c0_21, %c0_22] : memref<5x64x64xbf16, #tpu.memory_space<vmem>>, vector<1x64x64xbf16>
    %31 = vector.shape_cast %30 : vector<1x64x64xbf16> to vector<64x64xbf16>
    %32 = arith.truncf %29 : vector<64x128xf32> to vector<64x128xbf16>
    %cst_23 = arith.constant dense<0.000000e+00> : vector<64x128xf32>
    %33 = tpu.matmul %31, %32, %cst_23 {dimension_numbers = #tpu.dot_dimension_numbers<[1], [0], [0], [1], [0, 0, 1, 1], [], []>} : vector<64x64xbf16>, vector<64x128xbf16>, vector<64x128xf32> -> vector<64x128xf32>
    %cst_24 = arith.constant 0.000000e+00 : f32
    %34 = vector.broadcast %cst_24 : f32 to vector<64x128xf32>
    %35 = arith.maximumf %33, %34 : vector<64x128xf32>
    %c0_25 = arith.constant 0 : index
    %c0_26 = arith.constant 0 : index
    %36 = vector.load %arg4[%c0_25, %c0_26] : memref<8x64xbf16, #tpu.memory_space<vmem>>, vector<8x64xbf16>
    %37 = arith.truncf %35 : vector<64x128xf32> to vector<64x128xbf16>
    %cst_27 = arith.constant dense<0.000000e+00> : vector<8x128xf32>
    %38 = tpu.matmul %36, %37, %cst_27 {dimension_numbers = #tpu.dot_dimension_numbers<[1], [0], [0], [1], [0, 0, 1, 1], [], []>} : vector<8x64xbf16>, vector<64x128xbf16>, vector<8x128xf32> -> vector<8x128xf32>
    %c0_28 = arith.constant 0 : index
    %c0_29 = arith.constant 0 : index
    %39 = vector.load %arg5[%c0_28, %c0_29] : memref<8x128xf32, #tpu.memory_space<vmem>>, vector<8x128xf32>
    tpu.vector_store %arg5[%c0_28, %c0_29], %38 {strides = array<i32>} : memref<8x128xf32, #tpu.memory_space<vmem>>, vector<8x128xf32>,
    return
  }
  func.func @transform_0(%arg0: i32) -> (i32, i32) {
    %c0_i32 = arith.constant 0 : i32
    %c0_i32_0 = arith.constant 0 : i32
    return %c0_i32, %arg0 : i32, i32
  }
  func.func @transform_1(%arg0: i32) -> (i32, i32) {
    %c0_i32 = arith.constant 0 : i32
    %c0_i32_0 = arith.constant 0 : i32
    %c0_i32_1 = arith.constant 0 : i32
    return %c0_i32, %c0_i32_0 : i32, i32
  }
  func.func @transform_2(%arg0: i32) -> (i32, i32, i32) {
    %c0_i32 = arith.constant 0 : i32
    %c0_i32_0 = arith.constant 0 : i32
    %c0_i32_1 = arith.constant 0 : i32
    %c0_i32_2 = arith.constant 0 : i32
    return %c0_i32, %c0_i32_0, %c0_i32_1 : i32, i32, i32
  }
  func.func @transform_3(%arg0: i32) -> (i32, i32) {
    %c0_i32 = arith.constant 0 : i32
    %c0_i32_0 = arith.constant 0 : i32
    %c0_i32_1 = arith.constant 0 : i32
    return %c0_i32, %c0_i32_0 : i32, i32
  }
  func.func @transform_4(%arg0: i32) -> (i32, i32) {
    %c0_i32 = arith.constant 0 : i32
    %c0_i32_0 = arith.constant 0 : i32
    return %c0_i32, %arg0 : i32, i32
  }
}

</mosaic_0001>

<bundles_post_ra>
// kernel: _lambda_.1
= control target key start
LH: loop header
LB: loop body
LE: loop exit
PB: predicated region body
PF: predicated region fallthrough
CT: control target
= control target key end

     0   :  { %9 = vsyncpa [#allocation3], 0  ;;  %s1049_s15 = smov [#allocation2]   ;;  %s1124_s0 = inlined_call_operand.vmem [shape: f32[8,128], index: 0, kind: input, shape index: {}]   ;;  %s1125_s1 = inlined_call_operand.vmem [shape: bf16[64,8], index: 1, kind: input, shape index: {}]   ;;  %s1126_s2 = inlined_call_operand.hbm [shape: bf16[5,64,64], index: 2, kind: input, shape index: {}]   ;;  %s1127_s3 = inlined_call_operand.vmem [shape: bf16[8,64], index: 3, kind: input, shape index: {}]   ;;  %s1128_s4 = inlined_call_operand.vmem [shape: f32[8,128], index: 4, kind: output, shape index: {}]  }
   0x1   :  { %s19_s16 = sshll.u32 %s1049_s15, 4  ;;  %s20_s16 = int_to_ptr.vmem [resolvable:$true] %s19_s16 }
   0x2   :  { %s1035_s17 = scalar_lea.vmem %s20_s16, 2560  ;;  %p1040_p1 = scmp.lt.s32.totalorder %s20_s16, %s20_s16 }
   0x3   :  { %p1036_p0 = scmp.ne.s32.totalorder %s20_s16, %s1035_s17  ;;  %p1041_p2 = scmp.lt.s32.totalorder %s1035_s17, %s1035_s17 }
   0x5   :  { %p1042_p3 = por %p1041_p2, %p1040_p1 }
   0x7   :  { %p1043_p4 = pnand %p1042_p3, %p1036_p0 }
   0x9   :  { %1046 = shalt.err (!%p1043_p4)
}
   0xa   :  { %s1050_s18 = smov 64   ;;  %s1051_s19 = smov 4  }
   0xb   :  { %25 = dma.hbm_to_vmem [thread:$0]  %s1126_s2, 2560, %s20_s16, [#allocation3], %s1050_s18, %s1050_s18, %s1051_s19  }
   0xc   :  { %1047 = dma.done.wait [#allocation3], 2560  }
   0xd   :  { %1048 = vsyncadd [#allocation3], 4294964736  ;;  %vm75_vm0 = vcmask 1043456   ;;  %v32_v0 = vld [vmem:[%s1124_s0] sm:$0xff]  ;;  %vm62_vm1 = vcmask 64512   ;;  %v1004_v4 = vld [vmem:[%s1125_s1 + $0x8] sm:$0xff]  }
   0xe   :  { %v33_v1 = vpack.c.bf16 %v32_v0, %v32_v0  ;;  %v1003_v2 = vld [vmem:[%s1125_s1] sm:$0xff]   ;;  %v1005_v5 = vld [vmem:[%s1125_s1 + $0x10] sm:$0xff]   ;;  %v1006_v6 = vld [vmem:[%s1125_s1 + $0x18] sm:$0xff]   ;;  %vm184_vm2 = vcmask 523264   ;;  %vm1053_vm3 = vmmov 0  }
   0xf   :  { %897 = vmatprep.mubr.msk.bf16.mxu0 %vm62_vm1, %v1003_v2  ;;  %v1007_v7 = vld [vmem:[#allocation2] sm:$0xff]   ;;  %v1008_v28 = vld [vmem:[#allocation2 + $0x8] sm:$0xff]   ;;  %v1009_v29 = vld [vmem:[#allocation2 + $0x10] sm:$0xff]  }
  0x10   :  { %997 = vmatprep.subr.msk.bf16.mxu0 %vm75_vm0, %v33_v1  ;;  %v77_v3 = vsel %vm75_vm0, %v33_v1, 0  ;;  %913 = vmatprep.mubr.msk.bf16.mxu1 %vm184_vm2, %v1007_v7  ;;  %v1010_v30 = vld [vmem:[#allocation2 + $0x18] sm:$0xff]   ;;  %v1011_v31 = vld [vmem:[#allocation2 + $0x20] sm:$0xff]   ;;  %v1012_v52 = vld [vmem:[#allocation2 + $0x28] sm:$0xff]  }
  0x11   :  { %896 = vmatpush3.bf16.msra.mxu0 %v77_v3  ;;  %v1013_v53 = vld [vmem:[#allocation2 + $0x30] sm:$0xff]   ;;  %v1014_v54 = vld [vmem:[#allocation2 + $0x38] sm:$0xff]   ;;  %v1015_v55 = vld [vmem:[#allocation2 + $0x40] sm:$0xff]  }
  0x14   :  { %898 = vmatmul.mubr.msk.bf16.vlgmr.msra.gmra.mxu0 %vm62_vm1, %v1004_v4 }
  0x15   :  { %901 = vmatprep.mubr.msk.bf16.mxu0 %vm62_vm1, %v1005_v5 }
  0x1c   :  { %902 = vmatmul.mubr.msk.bf16.gmra.mxu0 %vm62_vm1, %v1006_v6 }
  0x1d   :  { %929 = vmatprep.mubr.msk.bf16.mxu0 %vm184_vm2, %v1011_v31 }
  0xd4   :  { %v899_v8 = vpop.f32.mrf.mxu0 }
  0xd5   :  { %v146_v23 = vmax.f32 %v899_v8, 0.0 }
  0xd6   :  { %v113_v9 = vpop.f32.mrf.mxu0 }
  0xd7   :  { %v144_v26 = vmax.f32 %v113_v9, 0.0 }
  0xd8   :  { %v900_v10 = vpop.f32.mrf.mxu0 }
  0xd9   :  { %v147_v21 = vmax.f32 %v900_v10, 0.0 }
  0xda   :  { %v116_v11 = vpop.f32.mrf.mxu0 }
  0xdb   :  { %v161_v24 = vpack.c.bf16 %v147_v21, %v146_v23  ;;  %v145_v25 = vmax.f32 %v116_v11, 0.0 }
  0xdc   :  { %v903_v12 = vpop.f32.mrf.mxu0 }
  0xdd   :  { %v150_v15 = vmax.f32 %v903_v12, 0.0  ;;  %v160_v27 = vpack.c.bf16 %v145_v25, %v144_v26  ;;  %v1016_v12 = vld [vmem:[#allocation2 + $0x48] sm:$0xff]  }
  0xde   :  { %v129_v13 = vpop.f32.mrf.mxu0 }
  0xdf   :  { %v148_v18 = vmax.f32 %v129_v13, 0.0  ;;  %v1017_v13 = vld [vmem:[#allocation2 + $0x50] sm:$0xff]  }
  0xe0   :  { %v904_v14 = vpop.f32.mrf.mxu0 }
  0xe1   :  { %v151_v16 = vmax.f32 %v904_v14, 0.0  ;;  %v1018_v14 = vld [vmem:[#allocation2 + $0x58] sm:$0xff]  }
  0xe2   :  { %v132_v17 = vpop.f32.mrf.mxu0 }
  0xe3   :  { %v149_v19 = vmax.f32 %v132_v17, 0.0  ;;  %v163_v20 = vpack.c.bf16 %v151_v16, %v150_v15  ;;  %v1019_v15 = vld [vmem:[#allocation2 + $0x60] sm:$0xff]  }
  0xe5   :  { %v162_v22 = vpack.c.bf16 %v149_v19, %v148_v18  ;;  %905 = vmatprep.subr.bf16.mxu1 %v163_v20 }
  0xe6   :  { %906 = vmatpush3.bf16.msra.mxu1 %v163_v20 }
  0xe7   :  { %907 = vmatprep.subr.bf16.mxu1 %v162_v22 }
  0xea   :  { %908 = vmatpush3.bf16.msra.mxu1 %v162_v22 }
  0xeb   :  { %909 = vmatprep.subr.bf16.mxu1 %v161_v24 }
  0xee   :  { %910 = vmatpush3.bf16.msra.mxu1 %v161_v24 }
  0xef   :  { %911 = vmatprep.subr.bf16.mxu1 %v160_v27 }
  0xf2   :  { %912 = vmatpush3.bf16.msra.mxu1 %v160_v27 }
  0xf5   :  { %914 = vmatmul.mubr.msk.bf16.vlgmr.msra.gmra.mxu1 %vm184_vm2, %v1008_v28 }
  0xf6   :  { %917 = vmatprep.mubr.msk.bf16.mxu1 %vm184_vm2, %v1009_v29 }
  0xfd   :  { %918 = vmatmul.mubr.msk.bf16.gmra.mxu1 %vm184_vm2, %v1010_v30 }
  0xfe   :  { %945 = vmatprep.mubr.msk.bf16.mxu1 %vm184_vm2, %v1015_v55 }
 0x1b5   :  { %v915_v32 = vpop.f32.mrf.mxu1 }
 0x1b6   :  { %v264_v47 = vmax.f32 %v915_v32, 0.0 }
 0x1b7   :  { %v231_v33 = vpop.f32.mrf.mxu1 }
 0x1b8   :  { %v262_v50 = vmax.f32 %v231_v33, 0.0 }
 0x1b9   :  { %v916_v34 = vpop.f32.mrf.mxu1 }
 0x1ba   :  { %v265_v45 = vmax.f32 %v916_v34, 0.0 }
 0x1bb   :  { %v234_v35 = vpop.f32.mrf.mxu1 }
 0x1bc   :  { %v280_v48 = vpack.c.bf16 %v265_v45, %v264_v47  ;;  %v263_v49 = vmax.f32 %v234_v35, 0.0 }
 0x1bd   :  { %v919_v36 = vpop.f32.mrf.mxu1 }
 0x1be   :  { %v268_v39 = vmax.f32 %v919_v36, 0.0  ;;  %v279_v51 = vpack.c.bf16 %v263_v49, %v262_v50  ;;  %v1020_v36 = vld [vmem:[#allocation2 + $0x68] sm:$0xff]  }
 0x1bf   :  { %v247_v37 = vpop.f32.mrf.mxu1 }
 0x1c0   :  { %v266_v42 = vmax.f32 %v247_v37, 0.0  ;;  %v1021_v37 = vld [vmem:[#allocation2 + $0x70] sm:$0xff]  }
 0x1c1   :  { %v920_v38 = vpop.f32.mrf.mxu1 }
 0x1c2   :  { %v269_v40 = vmax.f32 %v920_v38, 0.0  ;;  %v1022_v38 = vld [vmem:[#allocation2 + $0x78] sm:$0xff]  }
 0x1c3   :  { %v250_v41 = vpop.f32.mrf.mxu1 }
 0x1c4   :  { %v282_v43 = vpack.c.bf16 %v269_v40, %v268_v39  ;;  %v267_v44 = vmax.f32 %v250_v41, 0.0  ;;  %v1023_v39 = vld [vmem:[#allocation2 + $0x80] sm:$0xff]  }
 0x1c6   :  { %v281_v46 = vpack.c.bf16 %v267_v44, %v266_v42  ;;  %921 = vmatprep.subr.bf16.mxu0 %v282_v43 }
 0x1c7   :  { %922 = vmatpush3.bf16.msra.mxu0 %v282_v43 }
 0x1c8   :  { %923 = vmatprep.subr.bf16.mxu0 %v281_v46 }
 0x1cb   :  { %924 = vmatpush3.bf16.msra.mxu0 %v281_v46 }
 0x1cc   :  { %925 = vmatprep.subr.bf16.mxu0 %v280_v48 }
 0x1cf   :  { %926 = vmatpush3.bf16.msra.mxu0 %v280_v48 }
 0x1d0   :  { %927 = vmatprep.subr.bf16.mxu0 %v279_v51 }
 0x1d3   :  { %928 = vmatpush3.bf16.msra.mxu0 %v279_v51 }
 0x1d6   :  { %930 = vmatmul.mubr.msk.bf16.vlgmr.msra.gmra.mxu0 %vm184_vm2, %v1012_v52 }
 0x1d7   :  { %933 = vmatprep.mubr.msk.bf16.mxu0 %vm184_vm2, %v1013_v53 }
 0x1de   :  { %934 = vmatmul.mubr.msk.bf16.gmra.mxu0 %vm184_vm2, %v1014_v54 }
 0x1df   :  { %961 = vmatprep.mubr.msk.bf16.mxu0 %vm184_vm2, %v1019_v15 }
 0x296   :  { %v931_v56 = vpop.f32.mrf.mxu0 }
 0x297   :  { %v382_v7 = vmax.f32 %v931_v56, 0.0 }
 0x298   :  { %v349_v57 = vpop.f32.mrf.mxu0 }
 0x299   :  { %v380_v10 = vmax.f32 %v349_v57, 0.0 }
 0x29a   :  { %v932_v58 = vpop.f32.mrf.mxu0 }
 0x29b   :  { %v383_v5 = vmax.f32 %v932_v58, 0.0 }
 0x29c   :  { %v352_v59 = vpop.f32.mrf.mxu0 }
 0x29d   :  { %v398_v8 = vpack.c.bf16 %v383_v5, %v382_v7  ;;  %v381_v9 = vmax.f32 %v352_v59, 0.0 }
 0x29e   :  { %v935_v60 = vpop.f32.mrf.mxu0 }
 0x29f   :  { %v386_v63 = vmax.f32 %v935_v60, 0.0  ;;  %v397_v11 = vpack.c.bf16 %v381_v9, %v380_v10  ;;  %v1024_v60 = vld [vmem:[#allocation2 + $0x88] sm:$0xff]  }
 0x2a0   :  { %v365_v61 = vpop.f32.mrf.mxu0 }
 0x2a1   :  { %v384_v2 = vmax.f32 %v365_v61, 0.0  ;;  %v1025_v61 = vld [vmem:[#allocation2 + $0x90] sm:$0xff]  }
 0x2a2   :  { %v936_v62 = vpop.f32.mrf.mxu0 }
 0x2a3   :  { %v387_v0 = vmax.f32 %v936_v62, 0.0  ;;  %v1026_v62 = vld [vmem:[#allocation2 + $0x98] sm:$0xff]  }
 0x2a4   :  { %v368_v1 = vpop.f32.mrf.mxu0 }
 0x2a5   :  { %v400_v3 = vpack.c.bf16 %v387_v0, %v386_v63  ;;  %v385_v4 = vmax.f32 %v368_v1, 0.0  ;;  %v1052_v63 = vmov 0.0  }
 0x2a7   :  { %v399_v6 = vpack.c.bf16 %v385_v4, %v384_v2  ;;  %937 = vmatprep.subr.bf16.mxu1 %v400_v3 }
 0x2a8   :  { %938 = vmatpush3.bf16.msra.mxu1 %v400_v3 }
 0x2a9   :  { %939 = vmatprep.subr.bf16.mxu1 %v399_v6 }
 0x2ac   :  { %940 = vmatpush3.bf16.msra.mxu1 %v399_v6 }
 0x2ad   :  { %941 = vmatprep.subr.bf16.mxu1 %v398_v8 }
 0x2b0   :  { %942 = vmatpush3.bf16.msra.mxu1 %v398_v8 }
 0x2b1   :  { %943 = vmatprep.subr.bf16.mxu1 %v397_v11 }
 0x2b4   :  { %944 = vmatpush3.bf16.msra.mxu1 %v397_v11 }
 0x2b7   :  { %946 = vmatmul.mubr.msk.bf16.vlgmr.msra.gmra.mxu1 %vm184_vm2, %v1016_v12 }
 0x2b8   :  { %949 = vmatprep.mubr.msk.bf16.mxu1 %vm184_vm2, %v1017_v13 }
 0x2bf   :  { %950 = vmatmul.mubr.msk.bf16.gmra.mxu1 %vm184_vm2, %v1018_v14 }
 0x2c0   :  { %977 = vmatprep.mubr.msk.bf16.mxu1 %vm184_vm2, %v1023_v39 }
 0x377   :  { %v947_v16 = vpop.f32.mrf.mxu1 }
 0x378   :  { %v500_v31 = vmax.f32 %v947_v16, 0.0 }
 0x379   :  { %v467_v17 = vpop.f32.mrf.mxu1 }
 0x37a   :  { %v498_v34 = vmax.f32 %v467_v17, 0.0 }
 0x37b   :  { %v948_v18 = vpop.f32.mrf.mxu1 }
 0x37c   :  { %v501_v29 = vmax.f32 %v948_v18, 0.0 }
 0x37d   :  { %v470_v19 = vpop.f32.mrf.mxu1 }
 0x37e   :  { %v516_v32 = vpack.c.bf16 %v501_v29, %v500_v31  ;;  %v499_v33 = vmax.f32 %v470_v19, 0.0 }
 0x37f   :  { %v951_v20 = vpop.f32.mrf.mxu1 }
 0x380   :  { %v504_v23 = vmax.f32 %v951_v20, 0.0  ;;  %v515_v35 = vpack.c.bf16 %v499_v33, %v498_v34  ;;  %v742_v20 = vld [vmem:[%s1127_s3] sm:$0xf] }
 0x381   :  { %v483_v21 = vpop.f32.mrf.mxu1 }
 0x382   :  { %v502_v26 = vmax.f32 %v483_v21, 0.0 }
 0x383   :  { %v952_v22 = vpop.f32.mrf.mxu1 }
 0x384   :  { %v505_v24 = vmax.f32 %v952_v22, 0.0 }
 0x385   :  { %v486_v25 = vpop.f32.mrf.mxu1 }
 0x386   :  { %v518_v27 = vpack.c.bf16 %v505_v24, %v504_v23  ;;  %v503_v28 = vmax.f32 %v486_v25, 0.0 }
 0x388   :  { %v517_v30 = vpack.c.bf16 %v503_v28, %v502_v26  ;;  %953 = vmatprep.subr.bf16.mxu0 %v518_v27 }
 0x389   :  { %954 = vmatpush3.bf16.msra.mxu0 %v518_v27 }
 0x38a   :  { %955 = vmatprep.subr.bf16.mxu0 %v517_v30 }
 0x38d   :  { %956 = vmatpush3.bf16.msra.mxu0 %v517_v30 }
 0x38e   :  { %957 = vmatprep.subr.bf16.mxu0 %v516_v32 }
 0x391   :  { %958 = vmatpush3.bf16.msra.mxu0 %v516_v32 }
 0x392   :  { %959 = vmatprep.subr.bf16.mxu0 %v515_v35 }
 0x395   :  { %960 = vmatpush3.bf16.msra.mxu0 %v515_v35 }
 0x396   :  { %985 = vmatprep.subr.bf16.mxu0 %v1052_v63 }
 0x398   :  { %962 = vmatmul.mubr.msk.bf16.vlgmr.msra.gmra.mxu0 %vm184_vm2, %v1020_v36 }
 0x399   :  { %965 = vmatprep.mubr.msk.bf16.mxu0 %vm184_vm2, %v1021_v37 }
 0x3a0   :  { %966 = vmatmul.mubr.msk.bf16.gmra.mxu0 %vm184_vm2, %v1022_v38 }
 0x3a1   :  { %993 = vmatprep.mubr.msk.bf16.mxu0 %vm1053_vm3, %v1052_v63 }
 0x458   :  { %v963_v40 = vpop.f32.mrf.mxu0 }
 0x459   :  { %v618_v55 = vmax.f32 %v963_v40, 0.0 }
 0x45a   :  { %v585_v41 = vpop.f32.mrf.mxu0 }
 0x45b   :  { %v616_v58 = vmax.f32 %v585_v41, 0.0 }
 0x45c   :  { %v964_v42 = vpop.f32.mrf.mxu0 }
 0x45d   :  { %v619_v53 = vmax.f32 %v964_v42, 0.0 }
 0x45e   :  { %v588_v43 = vpop.f32.mrf.mxu0 }
 0x45f   :  { %v634_v56 = vpack.c.bf16 %v619_v53, %v618_v55  ;;  %v617_v57 = vmax.f32 %v588_v43, 0.0 }
 0x460   :  { %v967_v44 = vpop.f32.mrf.mxu0 }
 0x461   :  { %v622_v47 = vmax.f32 %v967_v44, 0.0  ;;  %v633_v59 = vpack.c.bf16 %v617_v57, %v616_v58 }
 0x462   :  { %v601_v45 = vpop.f32.mrf.mxu0 }
 0x463   :  { %v620_v50 = vmax.f32 %v601_v45, 0.0 }
 0x464   :  { %v968_v46 = vpop.f32.mrf.mxu0 }
 0x465   :  { %v623_v48 = vmax.f32 %v968_v46, 0.0 }
 0x466   :  { %v604_v49 = vpop.f32.mrf.mxu0 }
 0x467   :  { %v636_v51 = vpack.c.bf16 %v623_v48, %v622_v47  ;;  %v621_v52 = vmax.f32 %v604_v49, 0.0 }
 0x469   :  { %v635_v54 = vpack.c.bf16 %v621_v52, %v620_v50  ;;  %969 = vmatprep.subr.bf16.mxu1 %v636_v51 }
 0x46a   :  { %970 = vmatpush3.bf16.msra.mxu1 %v636_v51 }
 0x46b   :  { %971 = vmatprep.subr.bf16.mxu1 %v635_v54 }
 0x46e   :  { %972 = vmatpush3.bf16.msra.mxu1 %v635_v54 }
 0x46f   :  { %973 = vmatprep.subr.bf16.mxu1 %v634_v56 }
 0x472   :  { %974 = vmatpush3.bf16.msra.mxu1 %v634_v56 }
 0x473   :  { %975 = vmatprep.subr.bf16.mxu1 %v633_v59 }
 0x476   :  { %976 = vmatpush3.bf16.msra.mxu1 %v633_v59 }
 0x479   :  { %978 = vmatmul.mubr.msk.bf16.vlgmr.msra.gmra.mxu1 %vm184_vm2, %v1024_v60 }
 0x47a   :  { %981 = vmatprep.mubr.msk.bf16.mxu1 %vm184_vm2, %v1025_v61 }
 0x481   :  { %982 = vmatmul.mubr.msk.bf16.gmra.mxu1 %vm184_vm2, %v1026_v62 }
 0x539   :  { %v979_v0 = vpop.f32.mrf.mxu1 }
 0x53a   :  { %v736_v15 = vmax.f32 %v979_v0, 0.0 }
 0x53b   :  { %v703_v1 = vpop.f32.mrf.mxu1 }
 0x53c   :  { %v734_v18 = vmax.f32 %v703_v1, 0.0 }
 0x53d   :  { %v980_v2 = vpop.f32.mrf.mxu1 }
 0x53e   :  { %v737_v13 = vmax.f32 %v980_v2, 0.0 }
 0x53f   :  { %v706_v3 = vpop.f32.mrf.mxu1 }
 0x540   :  { %v744_v16 = vpack.c.bf16 %v737_v13, %v736_v15  ;;  %v735_v17 = vmax.f32 %v706_v3, 0.0 }
 0x541   :  { %v983_v4 = vpop.f32.mrf.mxu1 }
 0x542   :  { %v740_v7 = vmax.f32 %v983_v4, 0.0  ;;  %v743_v19 = vpack.c.bf16 %v735_v17, %v734_v18 }
 0x543   :  { %v719_v5 = vpop.f32.mrf.mxu1 }
 0x544   :  { %v738_v12 = vmax.f32 %v719_v5, 0.0 }
 0x545   :  { %v984_v6 = vpop.f32.mrf.mxu1 }
 0x546   :  { %v741_v8 = vmax.f32 %v984_v6, 0.0 }
 0x547   :  { %v722_v9 = vpop.f32.mrf.mxu1 }
 0x548   :  { %v746_v10 = vpack.c.bf16 %v741_v8, %v740_v7  ;;  %v739_v11 = vmax.f32 %v722_v9, 0.0 }
 0x54a   :  { %986 = vmatpush3.bf16.msra.mxu0 %v746_v10  ;;  %v745_v14 = vpack.c.bf16 %v739_v11, %v738_v12 }
 0x54b   :  { %987 = vmatprep.subr.bf16.mxu0 %v1052_v63 }
 0x54e   :  { %988 = vmatpush3.bf16.msra.mxu0 %v745_v14 }
 0x54f   :  { %989 = vmatprep.subr.bf16.mxu0 %v1052_v63 }
 0x552   :  { %990 = vmatpush3.bf16.msra.mxu0 %v744_v16 }
 0x553   :  { %991 = vmatprep.subr.bf16.mxu0 %v1052_v63 }
 0x556   :  { %992 = vmatpush3.bf16.msra.mxu0 %v743_v19 }
 0x559   :  { %994 = vmatmul.mubr.msk.bf16.vlgmr.msra.gmra.mxu0 %vm184_vm2, %v742_v20 }
 0x619   :  { %v784_v21 = vpop.f32.mrf.mxu0 }
 0x61a   :  { %790 = vst [vmem:[%s1128_s4] sm:$0xff] %v784_v21 }
 0x61b   :  { %v995_v22 = vpop.f32.mrf.mxu0 }
 0x61d   :  { %v787_v23 = vpop.f32.mrf.mxu0 }
 0x61f   :  { %v996_v24 = vpop.f32.mrf.mxu0 }
 0x620   :  { %795 = vsyncpa [#allocation3], 1 }

</bundles_post_ra>
